<compile_context>
chip_gen: v6e
topology: v6e:2x2x1
jax: 0.10.0
libtpu: 0.0.40
codegen_flags: <defaults>
</compile_context>

<pallas_src>
import functools

import jax
import jax.numpy as jnp
from jax.experimental import pallas as pl
from jax.experimental.pallas import tpu as pltpu

LANE = 128


def _round_up(n, m):
    return ((n + m - 1) // m) * m


def actor_kernel(x_ref, w1_ref, w2_ref, w3_ref, b1_ref, b2_ref, b3_ref, o_ref,
                 *, action_size, mask_output):
    """x_ref: (TB, P_in); w1: (P_in, P_h); w2: (P_h, P_h); w3: (P_h, P_out);
    b1/b2: (1, P_h) f32; b3: (1, P_out) f32; o_ref: (TB, P_out) f32."""
    x = x_ref[...]

    # fc1 + ReLU (MXU inputs in x/W dtype, f32 accumulation; bias/ReLU in f32).
    h = jnp.dot(x, w1_ref[...], preferred_element_type=jnp.float32)
    h = jnp.maximum(h + b1_ref[...], 0.0)

    # fc2 + ReLU (cast activation back to the MXU input dtype right before the dot).
    h = jnp.dot(h.astype(x.dtype), w2_ref[...], preferred_element_type=jnp.float32)
    h = jnp.maximum(h + b2_ref[...], 0.0)

    # fc3 logits (f32).
    logits = jnp.dot(h.astype(x.dtype), w3_ref[...], preferred_element_type=jnp.float32)
    logits = logits + b3_ref[...]

    # log_softmax over the real action lanes. The mask is only emitted (trace-time
    # Python `if`) when the action dim is actually padded. NOTE: -1e30 sentinel is
    # only safe because logits stay f32.
    if mask_output:
        col = jax.lax.broadcasted_iota(jnp.int32, logits.shape, 1)
        logits = jnp.where(col < action_size, logits, -1e30)
    m = jnp.max(logits, axis=-1, keepdims=True)
    lse = jnp.log(jnp.sum(jnp.exp(logits - m), axis=-1, keepdims=True)) + m
    o_ref[...] = (logits - lse).astype(o_ref.dtype)


def pack_params(params, compute_dtype=jnp.float32):
    """Zero-pad each feature dim independently to a lane-aligned width.
    Weights -> compute_dtype, biases stay f32 (bias add is done in f32)."""
    w1, b1, w2, b2, w3, b3 = (params["w1"], params["b1"], params["w2"],
                              params["b2"], params["w3"], params["b3"])
    input_size, hidden_size = w1.shape
    action_size = w3.shape[1]

    p_in = _round_up(input_size, LANE)
    # v6e/v7x MXU is 256 wide: pad mid/large hiddens to 256; don't over-pad tiny ones.
    h_align = 256 if hidden_size >= 256 else LANE
    p_h = _round_up(hidden_size, h_align)
    p_out = _round_up(action_size, LANE)

    def pad_w(w, rows, cols):
        return jnp.pad(w, ((0, rows - w.shape[0]),
                           (0, cols - w.shape[1]))).astype(compute_dtype)

    def pad_b(b, cols):
        b = b.reshape(1, -1)
        return jnp.pad(b, ((0, 0), (0, cols - b.shape[1]))).astype(jnp.float32)

    packed = (pad_w(w1, p_in, p_h), pad_w(w2, p_h, p_h), pad_w(w3, p_h, p_out),
              pad_b(b1, p_h), pad_b(b2, p_h), pad_b(b3, p_out))
    return packed, (p_in, p_h, p_out)


def actor_network_forward(x, params, *, compute_dtype=jnp.float32,
                          block_batch=1024, min_grid_steps=1):
    """x: (B, input_size) float32. Returns (B, action_size) float32 log-probs.

    min_grid_steps=2 is useful on v7x so both TensorCores get a grid step
    (dimension_semantics=("parallel",)); it is harmless on v5e/v6e.
    """
    (w1, w2, w3, b1, b2, b3), (p_in, p_h, p_out) = pack_params(params, compute_dtype)
    action_size = params["w3"].shape[1]
    B, in_features = x.shape

    itemsize = jnp.dtype(compute_dtype).itemsize
    # 8 rows for f32, 16 for bf16 (2 rows/sublane), 32 for 8-bit dtypes.
    row_align = max(8, 32 // itemsize)

    num_steps = max(1, pl.cdiv(B, max(block_batch, row_align)))
    if num_steps < min_grid_steps and B > row_align:
        num_steps = min(min_grid_steps, pl.cdiv(B, row_align))
    tb = _round_up(pl.cdiv(B, num_steps), row_align)
    b_pad = tb * num_steps

    # Pad directly in the compute dtype (no full-size f32 intermediate on bf16 path).
    x_pad = jnp.pad(x.astype(compute_dtype),
                    ((0, b_pad - B), (0, p_in - in_features)))

    def build_call(weight_buffers):
        pinned = {"pipeline_mode": pl.Buffered(1)} if weight_buffers == 1 else {}
        in_specs = [
            pl.BlockSpec((tb, p_in), lambda i: (i, 0)),              # x tile (pipelined)
            pl.BlockSpec((p_in, p_h), lambda i: (0, 0), **pinned),   # W1 (pinned)
            pl.BlockSpec((p_h, p_h), lambda i: (0, 0), **pinned),    # W2 (pinned)
            pl.BlockSpec((p_h, p_out), lambda i: (0, 0), **pinned),  # W3 (pinned)
            pl.BlockSpec((1, p_h), lambda i: (0, 0), **pinned),      # b1
            pl.BlockSpec((1, p_h), lambda i: (0, 0), **pinned),      # b2
            pl.BlockSpec((1, p_out), lambda i: (0, 0), **pinned),    # b3
        ]
        # VMEM accounting: resident weights/biases + double-buffered x/out tiles.
        bytes_w = (p_in * p_h + p_h * p_h + p_h * p_out) * itemsize
        bytes_b = (2 * p_h + p_out) * 4
        bytes_io = 2 * tb * p_in * itemsize + 2 * tb * p_out * 4
        est = weight_buffers * (bytes_w + bytes_b) + bytes_io
        vmem_limit = int(min(64 * 2 ** 20, max(32 * 2 ** 20, int(est * 1.5))))

        return pl.pallas_call(
            functools.partial(actor_kernel, action_size=action_size,
                              mask_output=(p_out != action_size)),
            out_shape=jax.ShapeDtypeStruct((b_pad, p_out), jnp.float32),
            grid_spec=pltpu.PrefetchScalarGridSpec(
                num_scalar_prefetch=0,
                grid=(num_steps,),
                in_specs=in_specs,
                out_specs=pl.BlockSpec((tb, p_out), lambda i: (i, 0)),
            ),
            compiler_params=pltpu.CompilerParams(
                dimension_semantics=("parallel",),
                vmem_limit_bytes=vmem_limit),
        )

    args = (x_pad, w1, w2, w3, b1, b2, b3)
    try:
        out = build_call(weight_buffers=1)(*args)
    except Exception:
        # Fallback: installed Pallas rejected single-buffered pinned operands;
        # use the default double-buffered pipeline (functionally identical).
        out = build_call(weight_buffers=2)(*args)

    return out[:B, :action_size]


def init_params(key, input_size, hidden_size, action_size):
    """Mimics PyTorch nn.Linear default init (uniform +-1/sqrt(fan_in)).
    Weights stored as (in_features, out_features); biases as (1, out_features)."""
    def linear(k, fan_in, fan_out):
        kw, kb = jax.random.split(k)
        bound = 1.0 / jnp.sqrt(jnp.float32(fan_in))
        w = jax.random.uniform(kw, (fan_in, fan_out), jnp.float32, -bound, bound)
        b = jax.random.uniform(kb, (1, fan_out), jnp.float32, -bound, bound)
        return w, b

    k1, k2, k3 = jax.random.split(key, 3)
    w1, b1 = linear(k1, input_size, hidden_size)
    w2, b2 = linear(k2, hidden_size, hidden_size)
    w3, b3 = linear(k3, hidden_size, action_size)
    return {"w1": w1, "b1": b1, "w2": w2, "b2": b2, "w3": w3, "b3": b3}


def reference_forward(x, p):
    h1 = jnp.maximum(x @ p["w1"] + p["b1"], 0.0)
    h2 = jnp.maximum(h1 @ p["w2"] + p["b2"], 0.0)
    logits = h2 @ p["w3"] + p["b3"]
    return jax.nn.log_softmax(logits, axis=-1)


if __name__ == "__main__":
    # Small shapes consistent with the MLP: batch=8, input=16, hidden=32, actions=8.
    batch, input_size, hidden_size, action_size = 8, 16, 32, 8

    key = jax.random.PRNGKey(0)
    kx, kp, kx2 = jax.random.split(key, 3)
    x = jax.random.normal(kx, (batch, input_size), jnp.float32)
    params = init_params(kp, input_size, hidden_size, action_size)

    # 1) f32 path, single grid step. Tolerance accounts for XLA's default TPU
    #    matmul precision (bf16 passes) in the pure-JAX reference.
    out = jax.block_until_ready(actor_network_forward(x, params))
    ref = reference_forward(x, params)
    assert out.shape == (batch, action_size)
    assert jnp.allclose(out, ref, atol=5e-3, rtol=5e-3), "f32 mismatch vs reference"

    # 2) Larger batch on the bf16-MXU path: exercises a 2-step "parallel" grid
    #    (both v7x TensorCores), 16-row-aligned bf16 tiles, pinned single-buffered
    #    weights; looser tolerance since x is cast to bf16 before fc1.
    big_batch = 1024
    xb = jax.random.normal(kx2, (big_batch, input_size), jnp.float32)
    out_b = jax.block_until_ready(actor_network_forward(
        xb, params, compute_dtype=jnp.bfloat16, block_batch=1024, min_grid_steps=2))
    ref_b = reference_forward(xb, params)
    assert out_b.shape == (big_batch, action_size)
    assert jnp.allclose(out_b, ref_b, atol=5e-2, rtol=5e-2), "bf16 mismatch vs reference"

    print("KERNEL_OK")
</pallas_src>

<mosaic_0001>
module attributes {stable_mosaic.version = 11 : i64} {
  func.func @actor_kernel(%arg0: i32, %arg1: memref<8x128xf32, #tpu.memory_space<vmem>>, %arg2: memref<128x128xf32, #tpu.memory_space<vmem>>, %arg3: memref<128x128xf32, #tpu.memory_space<vmem>>, %arg4: memref<128x128xf32, #tpu.memory_space<vmem>>, %arg5: memref<1x128xf32, #tpu.memory_space<vmem>>, %arg6: memref<1x128xf32, #tpu.memory_space<vmem>>, %arg7: memref<1x128xf32, #tpu.memory_space<vmem>>, %arg8: memref<8x128xf32, #tpu.memory_space<vmem>>) attributes {dimension_semantics = [#tpu.dimension_semantics<parallel>], iteration_bounds = array<i64: 1>, scalar_prefetch = 0 : i64, scratch_operands = 0 : i64, tpu.core_type = #tpu.core_type<tc>, window_params = [{transform_indices = @transform_0, window_bounds = array<i64: 8, 128>}, {pipeline_mode = #tpu.pipeline_mode<synchronous>, transform_indices = @transform_1, window_bounds = array<i64: 128, 128>}, {pipeline_mode = #tpu.pipeline_mode<synchronous>, transform_indices = @transform_2, window_bounds = array<i64: 128, 128>}, {pipeline_mode = #tpu.pipeline_mode<synchronous>, transform_indices = @transform_3, window_bounds = array<i64: 128, 128>}, {pipeline_mode = #tpu.pipeline_mode<synchronous>, transform_indices = @transform_4, window_bounds = array<i64: 1, 128>}, {pipeline_mode = #tpu.pipeline_mode<synchronous>, transform_indices = @transform_5, window_bounds = array<i64: 1, 128>}, {pipeline_mode = #tpu.pipeline_mode<synchronous>, transform_indices = @transform_6, window_bounds = array<i64: 1, 128>}, {transform_indices = @transform_7, window_bounds = array<i64: 8, 128>}]} {
    %c0 = arith.constant 0 : index
    %c0_0 = arith.constant 0 : index
    %0 = vector.load %arg1[%c0, %c0_0] : memref<8x128xf32, #tpu.memory_space<vmem>>, vector<8x128xf32>
    %c0_1 = arith.constant 0 : index
    %c0_2 = arith.constant 0 : index
    %1 = vector.load %arg2[%c0_1, %c0_2] : memref<128x128xf32, #tpu.memory_space<vmem>>, vector<128x128xf32>
    %cst = arith.constant dense<0.000000e+00> : vector<8x128xf32>
    %2 = tpu.matmul %0, %1, %cst {dimension_numbers = #tpu.dot_dimension_numbers<[1], [0], [0], [1], [0, 0, 1, 1], [], []>} : vector<8x128xf32>, vector<128x128xf32>, vector<8x128xf32> -> vector<8x128xf32>
    %c0_3 = arith.constant 0 : index
    %c0_4 = arith.constant 0 : index
    %3 = vector.load %arg5[%c0_3, %c0_4] : memref<1x128xf32, #tpu.memory_space<vmem>>, vector<1x128xf32>
    %4 = vector.broadcast %3 : vector<1x128xf32> to vector<8x128xf32>
    %5 = arith.addf %2, %4 : vector<8x128xf32>
    %cst_5 = arith.constant 0.000000e+00 : f32
    %6 = vector.broadcast %cst_5 : f32 to vector<8x128xf32>
    %7 = arith.maximumf %5, %6 : vector<8x128xf32>
    %c0_6 = arith.constant 0 : index
    %c0_7 = arith.constant 0 : index
    %8 = vector.load %arg3[%c0_6, %c0_7] : memref<128x128xf32, #tpu.memory_space<vmem>>, vector<128x128xf32>
    %cst_8 = arith.constant dense<0.000000e+00> : vector<8x128xf32>
    %9 = tpu.matmul %7, %8, %cst_8 {dimension_numbers = #tpu.dot_dimension_numbers<[1], [0], [0], [1], [0, 0, 1, 1], [], []>} : vector<8x128xf32>, vector<128x128xf32>, vector<8x128xf32> -> vector<8x128xf32>
    %c0_9 = arith.constant 0 : index
    %c0_10 = arith.constant 0 : index
    %10 = vector.load %arg6[%c0_9, %c0_10] : memref<1x128xf32, #tpu.memory_space<vmem>>, vector<1x128xf32>
    %11 = vector.broadcast %10 : vector<1x128xf32> to vector<8x128xf32>
    %12 = arith.addf %9, %11 : vector<8x128xf32>
    %cst_11 = arith.constant 0.000000e+00 : f32
    %13 = vector.broadcast %cst_11 : f32 to vector<8x128xf32>
    %14 = arith.maximumf %12, %13 : vector<8x128xf32>
    %c0_12 = arith.constant 0 : index
    %c0_13 = arith.constant 0 : index
    %15 = vector.load %arg4[%c0_12, %c0_13] : memref<128x128xf32, #tpu.memory_space<vmem>>, vector<128x128xf32>
    %cst_14 = arith.constant dense<0.000000e+00> : vector<8x128xf32>
    %16 = tpu.matmul %14, %15, %cst_14 {dimension_numbers = #tpu.dot_dimension_numbers<[1], [0], [0], [1], [0, 0, 1, 1], [], []>} : vector<8x128xf32>, vector<128x128xf32>, vector<8x128xf32> -> vector<8x128xf32>
    %c0_15 = arith.constant 0 : index
    %c0_16 = arith.constant 0 : index
    %17 = vector.load %arg7[%c0_15, %c0_16] : memref<1x128xf32, #tpu.memory_space<vmem>>, vector<1x128xf32>
    %18 = vector.broadcast %17 : vector<1x128xf32> to vector<8x128xf32>
    %19 = arith.addf %16, %18 : vector<8x128xf32>
    %20 = tpu.iota {dimensions = array<i32: 1>} : vector<8x128xi32>
    %c8_i32 = arith.constant 8 : i32
    %21 = vector.broadcast %c8_i32 : i32 to vector<8x128xi32>
    %22 = arith.cmpi slt, %20, %21 : vector<8x128xi32>
    %cst_17 = arith.constant -1.000000e+30 : f32
    %23 = vector.broadcast %cst_17 : f32 to vector<8x128xf32>
    %24 = arith.select %22, %19, %23 : vector<8x128xi1>, vector<8x128xf32>
    %cst_18 = arith.constant dense<0xFF800000> : vector<8xf32>
    %25 = vector.multi_reduction <maximumf>, %24, %cst_18 [1] : vector<8x128xf32> to vector<8xf32>
    %26 = vector.shape_cast %25 : vector<8xf32> to vector<8x1xf32>
    %27 = vector.broadcast %26 : vector<8x1xf32> to vector<8x128xf32>
    %28 = arith.subf %24, %27 : vector<8x128xf32>
    %29 = math.exp %28 : vector<8x128xf32>
    %cst_19 = arith.constant dense<0.000000e+00> : vector<8xf32>
    %30 = vector.multi_reduction <add>, %29, %cst_19 [1] : vector<8x128xf32> to vector<8xf32>
    %31 = vector.shape_cast %30 : vector<8xf32> to vector<8x1xf32>
    %32 = math.log %31 : vector<8x1xf32>
    %33 = arith.addf %32, %26 : vector<8x1xf32>
    %34 = vector.broadcast %33 : vector<8x1xf32> to vector<8x128xf32>
    %35 = arith.subf %24, %34 : vector<8x128xf32>
    %c0_20 = arith.constant 0 : index
    %c0_21 = arith.constant 0 : index
    %36 = vector.load %arg8[%c0_20, %c0_21] : memref<8x128xf32, #tpu.memory_space<vmem>>, vector<8x128xf32>
    tpu.vector_store %arg8[%c0_20, %c0_21], %35 {strides = array<i32>} : memref<8x128xf32, #tpu.memory_space<vmem>>, vector<8x128xf32>,
    return
  }
  func.func @transform_0(%arg0: i32) -> (i32, i32) {
    %c0_i32 = arith.constant 0 : i32
    %c0_i32_0 = arith.constant 0 : i32
    return %arg0, %c0_i32 : i32, i32
  }
  func.func @transform_1(%arg0: i32) -> (i32, i32) {
    %c0_i32 = arith.constant 0 : i32
    %c0_i32_0 = arith.constant 0 : i32
    %c0_i32_1 = arith.constant 0 : i32
    return %c0_i32, %c0_i32_0 : i32, i32
  }
  func.func @transform_2(%arg0: i32) -> (i32, i32) {
    %c0_i32 = arith.constant 0 : i32
    %c0_i32_0 = arith.constant 0 : i32
    %c0_i32_1 = arith.constant 0 : i32
    return %c0_i32, %c0_i32_0 : i32, i32
  }
  func.func @transform_3(%arg0: i32) -> (i32, i32) {
    %c0_i32 = arith.constant 0 : i32
    %c0_i32_0 = arith.constant 0 : i32
    %c0_i32_1 = arith.constant 0 : i32
    return %c0_i32, %c0_i32_0 : i32, i32
  }
  func.func @transform_4(%arg0: i32) -> (i32, i32) {
    %c0_i32 = arith.constant 0 : i32
    %c0_i32_0 = arith.constant 0 : i32
    %c0_i32_1 = arith.constant 0 : i32
    return %c0_i32, %c0_i32_0 : i32, i32
  }
  func.func @transform_5(%arg0: i32) -> (i32, i32) {
    %c0_i32 = arith.constant 0 : i32
    %c0_i32_0 = arith.constant 0 : i32
    %c0_i32_1 = arith.constant 0 : i32
    return %c0_i32, %c0_i32_0 : i32, i32
  }
  func.func @transform_6(%arg0: i32) -> (i32, i32) {
    %c0_i32 = arith.constant 0 : i32
    %c0_i32_0 = arith.constant 0 : i32
    %c0_i32_1 = arith.constant 0 : i32
    return %c0_i32, %c0_i32_0 : i32, i32
  }
  func.func @transform_7(%arg0: i32) -> (i32, i32) {
    %c0_i32 = arith.constant 0 : i32
    %c0_i32_0 = arith.constant 0 : i32
    return %arg0, %c0_i32 : i32, i32
  }
}

module attributes {stable_mosaic.version = 11 : i64} {
  func.func @actor_kernel(%arg0: i32, %arg1: memref<8x128xf32, #tpu.memory_space<vmem>>, %arg2: memref<128x128xf32, #tpu.memory_space<vmem>>, %arg3: memref<128x128xf32, #tpu.memory_space<vmem>>, %arg4: memref<128x128xf32, #tpu.memory_space<vmem>>, %arg5: memref<1x128xf32, #tpu.memory_space<vmem>>, %arg6: memref<1x128xf32, #tpu.memory_space<vmem>>, %arg7: memref<1x128xf32, #tpu.memory_space<vmem>>, %arg8: memref<8x128xf32, #tpu.memory_space<vmem>>) attributes {dimension_semantics = [#tpu.dimension_semantics<parallel>], iteration_bounds = array<i64: 1>, scalar_prefetch = 0 : i64, scratch_operands = 0 : i64, tpu.core_type = #tpu.core_type<tc>, window_params = [{transform_indices = @transform_0, window_bounds = array<i64: 8, 128>}, {pipeline_mode = #tpu.pipeline_mode<synchronous>, transform_indices = @transform_1, window_bounds = array<i64: 128, 128>}, {pipeline_mode = #tpu.pipeline_mode<synchronous>, transform_indices = @transform_2, window_bounds = array<i64: 128, 128>}, {pipeline_mode = #tpu.pipeline_mode<synchronous>, transform_indices = @transform_3, window_bounds = array<i64: 128, 128>}, {pipeline_mode = #tpu.pipeline_mode<synchronous>, transform_indices = @transform_4, window_bounds = array<i64: 1, 128>}, {pipeline_mode = #tpu.pipeline_mode<synchronous>, transform_indices = @transform_5, window_bounds = array<i64: 1, 128>}, {pipeline_mode = #tpu.pipeline_mode<synchronous>, transform_indices = @transform_6, window_bounds = array<i64: 1, 128>}, {transform_indices = @transform_7, window_bounds = array<i64: 8, 128>}]} {
    %c0 = arith.constant 0 : index
    %c0_0 = arith.constant 0 : index
    %0 = vector.load %arg1[%c0, %c0_0] : memref<8x128xf32, #tpu.memory_space<vmem>>, vector<8x128xf32>
    %c0_1 = arith.constant 0 : index
    %c0_2 = arith.constant 0 : index
    %1 = vector.load %arg2[%c0_1, %c0_2] : memref<128x128xf32, #tpu.memory_space<vmem>>, vector<128x128xf32>
    %cst = arith.constant dense<0.000000e+00> : vector<8x128xf32>
    %2 = tpu.matmul %0, %1, %cst {dimension_numbers = #tpu.dot_dimension_numbers<[1], [0], [0], [1], [0, 0, 1, 1], [], []>} : vector<8x128xf32>, vector<128x128xf32>, vector<8x128xf32> -> vector<8x128xf32>
    %c0_3 = arith.constant 0 : index
    %c0_4 = arith.constant 0 : index
    %3 = vector.load %arg5[%c0_3, %c0_4] : memref<1x128xf32, #tpu.memory_space<vmem>>, vector<1x128xf32>
    %4 = vector.broadcast %3 : vector<1x128xf32> to vector<8x128xf32>
    %5 = arith.addf %2, %4 : vector<8x128xf32>
    %cst_5 = arith.constant 0.000000e+00 : f32
    %6 = vector.broadcast %cst_5 : f32 to vector<8x128xf32>
    %7 = arith.maximumf %5, %6 : vector<8x128xf32>
    %c0_6 = arith.constant 0 : index
    %c0_7 = arith.constant 0 : index
    %8 = vector.load %arg3[%c0_6, %c0_7] : memref<128x128xf32, #tpu.memory_space<vmem>>, vector<128x128xf32>
    %cst_8 = arith.constant dense<0.000000e+00> : vector<8x128xf32>
    %9 = tpu.matmul %7, %8, %cst_8 {dimension_numbers = #tpu.dot_dimension_numbers<[1], [0], [0], [1], [0, 0, 1, 1], [], []>} : vector<8x128xf32>, vector<128x128xf32>, vector<8x128xf32> -> vector<8x128xf32>
    %c0_9 = arith.constant 0 : index
    %c0_10 = arith.constant 0 : index
    %10 = vector.load %arg6[%c0_9, %c0_10] : memref<1x128xf32, #tpu.memory_space<vmem>>, vector<1x128xf32>
    %11 = vector.broadcast %10 : vector<1x128xf32> to vector<8x128xf32>
    %12 = arith.addf %9, %11 : vector<8x128xf32>
    %cst_11 = arith.constant 0.000000e+00 : f32
    %13 = vector.broadcast %cst_11 : f32 to vector<8x128xf32>
    %14 = arith.maximumf %12, %13 : vector<8x128xf32>
    %c0_12 = arith.constant 0 : index
    %c0_13 = arith.constant 0 : index
    %15 = vector.load %arg4[%c0_12, %c0_13] : memref<128x128xf32, #tpu.memory_space<vmem>>, vector<128x128xf32>
    %cst_14 = arith.constant dense<0.000000e+00> : vector<8x128xf32>
    %16 = tpu.matmul %14, %15, %cst_14 {dimension_numbers = #tpu.dot_dimension_numbers<[1], [0], [0], [1], [0, 0, 1, 1], [], []>} : vector<8x128xf32>, vector<128x128xf32>, vector<8x128xf32> -> vector<8x128xf32>
    %c0_15 = arith.constant 0 : index
    %c0_16 = arith.constant 0 : index
    %17 = vector.load %arg7[%c0_15, %c0_16] : memref<1x128xf32, #tpu.memory_space<vmem>>, vector<1x128xf32>
    %18 = vector.broadcast %17 : vector<1x128xf32> to vector<8x128xf32>
    %19 = arith.addf %16, %18 : vector<8x128xf32>
    %20 = tpu.iota {dimensions = array<i32: 1>} : vector<8x128xi32>
    %c8_i32 = arith.constant 8 : i32
    %21 = vector.broadcast %c8_i32 : i32 to vector<8x128xi32>
    %22 = arith.cmpi slt, %20, %21 : vector<8x128xi32>
    %cst_17 = arith.constant -1.000000e+30 : f32
    %23 = vector.broadcast %cst_17 : f32 to vector<8x128xf32>
    %24 = arith.select %22, %19, %23 : vector<8x128xi1>, vector<8x128xf32>
    %cst_18 = arith.constant dense<0xFF800000> : vector<8xf32>
    %25 = vector.multi_reduction <maximumf>, %24, %cst_18 [1] : vector<8x128xf32> to vector<8xf32>
    %26 = vector.shape_cast %25 : vector<8xf32> to vector<8x1xf32>
    %27 = vector.broadcast %26 : vector<8x1xf32> to vector<8x128xf32>
    %28 = arith.subf %24, %27 : vector<8x128xf32>
    %29 = math.exp %28 : vector<8x128xf32>
    %cst_19 = arith.constant dense<0.000000e+00> : vector<8xf32>
    %30 = vector.multi_reduction <add>, %29, %cst_19 [1] : vector<8x128xf32> to vector<8xf32>
    %31 = vector.shape_cast %30 : vector<8xf32> to vector<8x1xf32>
    %32 = math.log %31 : vector<8x1xf32>
    %33 = arith.addf %32, %26 : vector<8x1xf32>
    %34 = vector.broadcast %33 : vector<8x1xf32> to vector<8x128xf32>
    %35 = arith.subf %24, %34 : vector<8x128xf32>
    %c0_20 = arith.constant 0 : index
    %c0_21 = arith.constant 0 : index
    %36 = vector.load %arg8[%c0_20, %c0_21] : memref<8x128xf32, #tpu.memory_space<vmem>>, vector<8x128xf32>
    tpu.vector_store %arg8[%c0_20, %c0_21], %35 {strides = array<i32>} : memref<8x128xf32, #tpu.memory_space<vmem>>, vector<8x128xf32>,
    return
  }
  func.func @transform_0(%arg0: i32) -> (i32, i32) {
    %c0_i32 = arith.constant 0 : i32
    %c0_i32_0 = arith.constant 0 : i32
    return %arg0, %c0_i32 : i32, i32
  }
  func.func @transform_1(%arg0: i32) -> (i32, i32) {
    %c0_i32 = arith.constant 0 : i32
    %c0_i32_0 = arith.constant 0 : i32
    %c0_i32_1 = arith.constant 0 : i32
    return %c0_i32, %c0_i32_0 : i32, i32
  }
  func.func @transform_2(%arg0: i32) -> (i32, i32) {
    %c0_i32 = arith.constant 0 : i32
    %c0_i32_0 = arith.constant 0 : i32
    %c0_i32_1 = arith.constant 0 : i32
    return %c0_i32, %c0_i32_0 : i32, i32
  }
  func.func @transform_3(%arg0: i32) -> (i32, i32) {
    %c0_i32 = arith.constant 0 : i32
    %c0_i32_0 = arith.constant 0 : i32
    %c0_i32_1 = arith.constant 0 : i32
    return %c0_i32, %c0_i32_0 : i32, i32
  }
  func.func @transform_4(%arg0: i32) -> (i32, i32) {
    %c0_i32 = arith.constant 0 : i32
    %c0_i32_0 = arith.constant 0 : i32
    %c0_i32_1 = arith.constant 0 : i32
    return %c0_i32, %c0_i32_0 : i32, i32
  }
  func.func @transform_5(%arg0: i32) -> (i32, i32) {
    %c0_i32 = arith.constant 0 : i32
    %c0_i32_0 = arith.constant 0 : i32
    %c0_i32_1 = arith.constant 0 : i32
    return %c0_i32, %c0_i32_0 : i32, i32
  }
  func.func @transform_6(%arg0: i32) -> (i32, i32) {
    %c0_i32 = arith.constant 0 : i32
    %c0_i32_0 = arith.constant 0 : i32
    %c0_i32_1 = arith.constant 0 : i32
    return %c0_i32, %c0_i32_0 : i32, i32
  }
  func.func @transform_7(%arg0: i32) -> (i32, i32) {
    %c0_i32 = arith.constant 0 : i32
    %c0_i32_0 = arith.constant 0 : i32
    return %arg0, %c0_i32 : i32, i32
  }
}

</mosaic_0001>

<bundles_post_ra>
// kernel: tpu_custom_call.1
= control target key start
LH: loop header
LB: loop body
LE: loop exit
PB: predicated region body
PF: predicated region fallthrough
CT: control target
= control target key end

     0   :  { %12 = vsyncpa [#allocation3], 0  ;;  %s811_s0 = inlined_call_operand.hbm [shape: f32[8,128], index: 0, kind: input, shape index: {}]   ;;  %s812_s1 = inlined_call_operand.hbm [shape: f32[128,128], index: 1, kind: input, shape index: {}]   ;;  %s813_s2 = inlined_call_operand.hbm [shape: f32[128,128], index: 2, kind: input, shape index: {}]   ;;  %s814_s3 = inlined_call_operand.hbm [shape: f32[128,128], index: 3, kind: input, shape index: {}]   ;;  %s815_s4 = inlined_call_operand.vmem [shape: f32[1,128], index: 4, kind: input, shape index: {}]   ;;  %s816_s5 = inlined_call_operand.vmem [shape: f32[1,128], index: 5, kind: input, shape index: {}]   ;;  %s817_s6 = inlined_call_operand.vmem [shape: f32[1,128], index: 6, kind: input, shape index: {}]   ;;  %s818_s7 = inlined_call_operand.hbm [shape: f32[8,128], index: 7, kind: output, shape index: {}]  }
   0x1   :  { %13 = vsyncpa [#allocation6], 0 }
   0x2   :  { %14 = vsyncpa [#allocation9], 0 }
   0x3   :  { %15 = vsyncpa [#allocation4], 0  ;;  %s675_s24 = smov [#allocation5]  }
   0x4   :  { %s31_s25 = sshll.u32 %s675_s24, 4  ;;  %s32_s25 = int_to_ptr.vmem [resolvable:$true] %s31_s25 }
   0x5   :  { %s575_s26 = scalar_lea.vmem %s32_s25, 2048  ;;  %p580_p1 = scmp.lt.s32.totalorder %s32_s25, %s32_s25 }
   0x6   :  { %p576_p0 = scmp.ne.s32.totalorder %s32_s25, %s575_s26  ;;  %p581_p2 = scmp.lt.s32.totalorder %s575_s26, %s575_s26 }
   0x8   :  { %p582_p3 = por %p581_p2, %p580_p1 }
   0xa   :  { %p583_p4 = pnand %p582_p3, %p576_p0 }
   0xc   :  { %586 = shalt.err (!%p583_p4)
}
   0xd   :  { %s676_s27 = smov 128   ;;  %s677_s28 = smov 8  }
   0xe   :  { %37 = dma.hbm_to_vmem [thread:$0]  %s812_s1, 2048, %s32_s25, [#allocation6], %s676_s27, %s676_s27, %s677_s28  }
   0xf   :  { %s678_s8 = smov [#allocation2]   ;;  %s679_s10 = smov [#allocation7]  }
  0x10   :  { %s22_s9 = sshll.u32 %s678_s8, 4  ;;  %s43_s11 = sshll.u32 %s679_s10, 4  ;;  %s23_s9 = int_to_ptr.vmem [resolvable:$true] %s22_s9  ;;  %s44_s11 = int_to_ptr.vmem [resolvable:$true] %s43_s11 }
  0x11   :  { %s595_s12 = scalar_lea.vmem %s23_s9, 128  ;;  %p600_p6 = scmp.lt.s32.totalorder %s23_s9, %s23_s9 }
  0x12   :  { %p596_p5 = scmp.ne.s32.totalorder %s23_s9, %s595_s12  ;;  %p601_p7 = scmp.lt.s32.totalorder %s595_s12, %s595_s12 }
  0x14   :  { %p602_p8 = por %p601_p7, %p600_p6 }
  0x16   :  { %p603_p9 = pnand %p602_p8, %p596_p5 }
  0x18   :  { %606 = shalt.err (!%p603_p9)
}
  0x19   :  { %25 = dma.hbm_to_vmem [thread:$0]  %s811_s0, 128, %s23_s9, [#allocation3]  }
  0x1a   :  { %s615_s15 = scalar_lea.vmem %s44_s11, 2048  ;;  %p620_p11 = scmp.lt.s32.totalorder %s44_s11, %s44_s11 }
  0x1b   :  { %p616_p10 = scmp.ne.s32.totalorder %s44_s11, %s615_s15  ;;  %p621_p12 = scmp.lt.s32.totalorder %s615_s15, %s615_s15 }
  0x1d   :  { %p622_p13 = por %p621_p12, %p620_p11 }
  0x1f   :  { %p623_p0 = pnand %p622_p13, %p616_p10 }
  0x21   :  { %626 = shalt.err (!%p623_p0)
}
  0x22   :  { %49 = dma.hbm_to_vmem [thread:$0]  %s813_s2, 2048, %s44_s11, [#allocation6], %s676_s27, %s676_s27, %s677_s28  }
  0x23   :  { %s680_s17 = smov [#allocation8]  }
  0x24   :  { %s55_s18 = sshll.u32 %s680_s17, 4  ;;  %s56_s18 = int_to_ptr.vmem [resolvable:$true] %s55_s18 }
  0x25   :  { %s635_s19 = scalar_lea.vmem %s56_s18, 2048  ;;  %p640_p2 = scmp.lt.s32.totalorder %s56_s18, %s56_s18 }
  0x26   :  { %p636_p1 = scmp.ne.s32.totalorder %s56_s18, %s635_s19  ;;  %p641_p3 = scmp.lt.s32.totalorder %s635_s19, %s635_s19 }
  0x28   :  { %p642_p4 = por %p641_p3, %p640_p2 }
  0x2a   :  { %p643_p5 = pnand %p642_p4, %p636_p1 }
  0x2c   :  { %646 = shalt.err (!%p643_p5)
}
  0x2d   :  { %61 = dma.hbm_to_vmem [thread:$0]  %s814_s3, 2048, %s56_s18, [#allocation9], %s676_s27, %s676_s27, %s677_s28  }
  0x2e   :  { %667 = dma.done.wait [#allocation3], 128  }
  0x2f   :  { %668 = vsyncadd [#allocation3], 4294967168 }
  0x30   :  { %669 = dma.done.wait [#allocation6], 4096  }
  0x31   :  { %670 = vsyncadd [#allocation6], 4294963200 }
  0x32   :  { %671 = dma.done.wait [#allocation9], 2048  }
  0x33   :  { %672 = vsyncadd [#allocation9], 4294965248  ;;  %v681_v0 = vmov 0.0   ;;  %vm682_vm0 = vmmov 0   ;;  %v96_v1 = vld [vmem:[#allocation5 + $0x78] sm:$0xff]  ;;  %v95_v2 = vld [vmem:[#allocation5 + $0x70] sm:$0xff]  ;;  %v362_v60 = vlaneseq }
  0x34   :  { %449 = vmatprep.subr.mxu0 %v681_v0  ;;  %481 = vmatprep.mubr.msk.f32.mxu0 %vm682_vm0, %v681_v0  ;;  %v94_v3 = vld [vmem:[#allocation5 + $0x68] sm:$0xff]  ;;  %v93_v4 = vld [vmem:[#allocation5 + $0x60] sm:$0xff]  ;;  %v190_v5 = vld [vmem:[#allocation7 + $0x78] sm:$0xff] }
  0x35   :  { %484 = vmatprep.subr.mxu1 %v681_v0  ;;  %516 = vmatprep.mubr.msk.f32.mxu1 %vm682_vm0, %v681_v0  ;;  %v92_v6 = vld [vmem:[#allocation5 + $0x58] sm:$0xff]  ;;  %v189_v7 = vld [vmem:[#allocation7 + $0x70] sm:$0xff]  ;;  %v188_v8 = vld [vmem:[#allocation7 + $0x68] sm:$0xff]  ;;  %v363_v61 = vand.u32 127, %v362_v60 }
  0x36   :  { %450 = vmatpush3.msra.mxu0 %v96_v1  ;;  %485 = vmatpush3.msra.mxu1 %v190_v5  ;;  %v91_v9 = vld [vmem:[#allocation5 + $0x50] sm:$0xff]  ;;  %v187_v10 = vld [vmem:[#allocation7 + $0x60] sm:$0xff]  ;;  %v90_v11 = vld [vmem:[#allocation5 + $0x48] sm:$0xff] }
  0x37   :  { %451 = vmatprep.subr.mxu0 %v681_v0  ;;  %486 = vmatprep.subr.mxu1 %v681_v0  ;;  %v186_v12 = vld [vmem:[#allocation7 + $0x58] sm:$0xff]  ;;  %v89_v13 = vld [vmem:[#allocation5 + $0x40] sm:$0xff]  ;;  %v185_v14 = vld [vmem:[#allocation7 + $0x50] sm:$0xff]  ;;  %vm364_vm1 = vcmp.lt.s32.totalorder %v363_v61, 8 }
  0x38   :  { %452 = vmatpush3.msra.mxu0 %v95_v2  ;;  %487 = vmatpush3.msra.mxu1 %v189_v7  ;;  %v88_v15 = vld [vmem:[#allocation5 + $0x38] sm:$0xff]  ;;  %v184_v16 = vld [vmem:[#allocation7 + $0x48] sm:$0xff]  ;;  %v87_v17 = vld [vmem:[#allocation5 + $0x30] sm:$0xff] }
  0x39   :  { %453 = vmatprep.subr.mxu0 %v681_v0  ;;  %488 = vmatprep.subr.mxu1 %v681_v0  ;;  %v183_v18 = vld [vmem:[#allocation7 + $0x40] sm:$0xff]  ;;  %v86_v19 = vld [vmem:[#allocation5 + $0x28] sm:$0xff]  ;;  %v182_v20 = vld [vmem:[#allocation7 + $0x38] sm:$0xff] }
  0x3a   :  { %454 = vmatpush3.msra.mxu0 %v94_v3  ;;  %489 = vmatpush3.msra.mxu1 %v188_v8  ;;  %v85_v21 = vld [vmem:[#allocation5 + $0x20] sm:$0xff]  ;;  %v181_v22 = vld [vmem:[#allocation7 + $0x30] sm:$0xff]  ;;  %v84_v23 = vld [vmem:[#allocation5 + $0x18] sm:$0xff] }
  0x3b   :  { %455 = vmatprep.subr.mxu0 %v681_v0  ;;  %490 = vmatprep.subr.mxu1 %v681_v0  ;;  %v180_v24 = vld [vmem:[#allocation7 + $0x28] sm:$0xff]  ;;  %v83_v25 = vld [vmem:[#allocation5 + $0x10] sm:$0xff]  ;;  %v179_v26 = vld [vmem:[#allocation7 + $0x20] sm:$0xff] }
  0x3c   :  { %456 = vmatpush3.msra.mxu0 %v93_v4  ;;  %491 = vmatpush3.msra.mxu1 %v187_v10  ;;  %v82_v27 = vld [vmem:[#allocation5 + $0x8] sm:$0xff]  ;;  %v178_v28 = vld [vmem:[#allocation7 + $0x18] sm:$0xff]  ;;  %v81_v29 = vld [vmem:[#allocation5] sm:$0xff] }
  0x3d   :  { %457 = vmatprep.subr.mxu0 %v681_v0  ;;  %492 = vmatprep.subr.mxu1 %v681_v0  ;;  %v80_v30 = vld [vmem:[#allocation2] sm:$0xff]  ;;  %v177_v31 = vld [vmem:[#allocation7 + $0x10] sm:$0xff]  ;;  %v176_v32 = vld [vmem:[#allocation7 + $0x8] sm:$0xff] }
  0x3e   :  { %458 = vmatpush3.msra.mxu0 %v92_v6  ;;  %493 = vmatpush3.msra.mxu1 %v186_v12  ;;  %v175_v33 = vld [vmem:[#allocation7] sm:$0xff]  ;;  %v284_v34 = vld [vmem:[#allocation8 + $0x78] sm:$0xff]  ;;  %v283_v35 = vld [vmem:[#allocation8 + $0x70] sm:$0xff] }
  0x3f   :  { %459 = vmatprep.subr.mxu0 %v681_v0  ;;  %494 = vmatprep.subr.mxu1 %v681_v0  ;;  %v282_v36 = vld [vmem:[#allocation8 + $0x68] sm:$0xff]  ;;  %v281_v37 = vld [vmem:[#allocation8 + $0x60] sm:$0xff]  ;;  %v280_v38 = vld [vmem:[#allocation8 + $0x58] sm:$0xff] }
  0x40   :  { %460 = vmatpush3.msra.mxu0 %v91_v9  ;;  %495 = vmatpush3.msra.mxu1 %v185_v14  ;;  %v279_v39 = vld [vmem:[#allocation8 + $0x50] sm:$0xff]  ;;  %v278_v40 = vld [vmem:[#allocation8 + $0x48] sm:$0xff]  ;;  %v277_v41 = vld [vmem:[#allocation8 + $0x40] sm:$0xff] }
  0x41   :  { %461 = vmatprep.subr.mxu0 %v681_v0  ;;  %496 = vmatprep.subr.mxu1 %v681_v0  ;;  %v276_v42 = vld [vmem:[#allocation8 + $0x38] sm:$0xff]  ;;  %v275_v43 = vld [vmem:[#allocation8 + $0x30] sm:$0xff]  ;;  %v274_v44 = vld [vmem:[#allocation8 + $0x28] sm:$0xff] }
  0x42   :  { %462 = vmatpush3.msra.mxu0 %v90_v11  ;;  %497 = vmatpush3.msra.mxu1 %v184_v16  ;;  %v273_v45 = vld [vmem:[#allocation8 + $0x20] sm:$0xff]  ;;  %v272_v46 = vld [vmem:[#allocation8 + $0x18] sm:$0xff]  ;;  %v271_v52 = vld [vmem:[#allocation8 + $0x10] sm:$0xff] }
  0x43   :  { %463 = vmatprep.subr.mxu0 %v681_v0  ;;  %498 = vmatprep.subr.mxu1 %v681_v0  ;;  %v395_v47 = vld [vmem:[%s815_s4] ss:$0 sm:$0xff]  ;;  %v270_v53 = vld [vmem:[#allocation8 + $0x8] sm:$0xff]  ;;  %v269_v54 = vld [vmem:[#allocation8] sm:$0xff] }
  0x44   :  { %464 = vmatpush3.msra.mxu0 %v89_v13  ;;  %499 = vmatpush3.msra.mxu1 %v183_v18  ;;  %v396_v55 = vld [vmem:[%s816_s5] ss:$0 sm:$0xff]  ;;  %s683_s5 = smov [#allocation10]  }
  0x45   :  { %465 = vmatprep.subr.mxu0 %v681_v0  ;;  %500 = vmatprep.subr.mxu1 %v681_v0  ;;  %v397_v62 = vld [vmem:[%s817_s6] ss:$0 sm:$0xff]  ;;  %s384_s24 = sshll.u32 %s683_s5, 4  ;;  %s385_s24 = int_to_ptr.vmem [resolvable:$true] %s384_s24 }
  0x46   :  { %466 = vmatpush3.msra.mxu0 %v88_v15  ;;  %501 = vmatpush3.msra.mxu1 %v182_v20  ;;  %s647_s6 = scalar_lea.vmem %s385_s24, 128  ;;  %p652_p7 = scmp.lt.s32.totalorder %s385_s24, %s385_s24 }
  0x47   :  { %467 = vmatprep.subr.mxu0 %v681_v0  ;;  %502 = vmatprep.subr.mxu1 %v681_v0  ;;  %p648_p6 = scmp.ne.s32.totalorder %s385_s24, %s647_s6  ;;  %p653_p8 = scmp.lt.s32.totalorder %s647_s6, %s647_s6 }
  0x48   :  { %468 = vmatpush3.msra.mxu0 %v87_v17  ;;  %503 = vmatpush3.msra.mxu1 %v181_v22 }
  0x49   :  { %469 = vmatprep.subr.mxu0 %v681_v0  ;;  %504 = vmatprep.subr.mxu1 %v681_v0  ;;  %p654_p9 = por %p653_p8, %p652_p7 }
  0x4a   :  { %470 = vmatpush3.msra.mxu0 %v86_v19  ;;  %505 = vmatpush3.msra.mxu1 %v180_v24 }
  0x4b   :  { %471 = vmatprep.subr.mxu0 %v681_v0  ;;  %506 = vmatprep.subr.mxu1 %v681_v0  ;;  %p655_p10 = pnand %p654_p9, %p648_p6 }
  0x4c   :  { %472 = vmatpush3.msra.mxu0 %v85_v21  ;;  %507 = vmatpush3.msra.mxu1 %v179_v26 }
  0x4d   :  { %473 = vmatprep.subr.mxu0 %v681_v0  ;;  %508 = vmatprep.subr.mxu1 %v681_v0 }
  0x4e   :  { %474 = vmatpush3.msra.mxu0 %v84_v23  ;;  %509 = vmatpush3.msra.mxu1 %v178_v28 }
  0x4f   :  { %475 = vmatprep.subr.mxu0 %v681_v0  ;;  %510 = vmatprep.subr.mxu1 %v681_v0 }
  0x50   :  { %476 = vmatpush3.msra.mxu0 %v83_v25  ;;  %511 = vmatpush3.msra.mxu1 %v177_v31 }
  0x51   :  { %477 = vmatprep.subr.mxu0 %v681_v0  ;;  %512 = vmatprep.subr.mxu1 %v681_v0 }
  0x52   :  { %478 = vmatpush3.msra.mxu0 %v82_v27  ;;  %513 = vmatpush3.msra.mxu1 %v176_v32 }
  0x53   :  { %479 = vmatprep.subr.mxu0 %v681_v0  ;;  %514 = vmatprep.subr.mxu1 %v681_v0 }
  0x54   :  { %480 = vmatpush3.msra.mxu0 %v81_v29  ;;  %515 = vmatpush3.msra.mxu1 %v175_v33 }
  0x55   :  { %482 = vmatmul.mubr.f32.vlgmr.msra.gmra.mxu0 %v80_v30  ;;  %519 = vmatprep.subr.mxu0 %v681_v0 }
  0x56   :  { %551 = vmatprep.mubr.msk.f32.mxu0 %vm682_vm0, %v681_v0  ;;  %520 = vmatpush3.msra.mxu0 %v284_v34 }
  0x57   :  { %521 = vmatprep.subr.mxu0 %v681_v0 }
  0x58   :  { %522 = vmatpush3.msra.mxu0 %v283_v35 }
  0x59   :  { %523 = vmatprep.subr.mxu0 %v681_v0 }
  0x5a   :  { %524 = vmatpush3.msra.mxu0 %v282_v36 }
  0x5b   :  { %525 = vmatprep.subr.mxu0 %v681_v0 }
  0x5c   :  { %526 = vmatpush3.msra.mxu0 %v281_v37 }
  0x5d   :  { %527 = vmatprep.subr.mxu0 %v681_v0 }
  0x5e   :  { %528 = vmatpush3.msra.mxu0 %v280_v38 }
  0x5f   :  { %529 = vmatprep.subr.mxu0 %v681_v0 }
  0x60   :  { %530 = vmatpush3.msra.mxu0 %v279_v39 }
  0x61   :  { %531 = vmatprep.subr.mxu0 %v681_v0 }
  0x62   :  { %532 = vmatpush3.msra.mxu0 %v278_v40 }
  0x63   :  { %533 = vmatprep.subr.mxu0 %v681_v0 }
  0x64   :  { %534 = vmatpush3.msra.mxu0 %v277_v41 }
  0x65   :  { %535 = vmatprep.subr.mxu0 %v681_v0 }
  0x66   :  { %536 = vmatpush3.msra.mxu0 %v276_v42 }
  0x67   :  { %537 = vmatprep.subr.mxu0 %v681_v0 }
  0x68   :  { %538 = vmatpush3.msra.mxu0 %v275_v43 }
  0x69   :  { %539 = vmatprep.subr.mxu0 %v681_v0 }
  0x6a   :  { %540 = vmatpush3.msra.mxu0 %v274_v44 }
  0x6b   :  { %541 = vmatprep.subr.mxu0 %v681_v0 }
  0x6c   :  { %542 = vmatpush3.msra.mxu0 %v273_v45 }
  0x6d   :  { %543 = vmatprep.subr.mxu0 %v681_v0 }
  0x6e   :  { %544 = vmatpush3.msra.mxu0 %v272_v46 }
  0x6f   :  { %545 = vmatprep.subr.mxu0 %v681_v0 }
  0x70   :  { %546 = vmatpush3.msra.mxu0 %v271_v52 }
  0x71   :  { %547 = vmatprep.subr.mxu0 %v681_v0 }
  0x72   :  { %548 = vmatpush3.msra.mxu0 %v270_v53 }
  0x73   :  { %549 = vmatprep.subr.mxu0 %v681_v0 }
  0x74   :  { %550 = vmatpush3.msra.mxu0 %v269_v54 }
 0x115   :  { %v170_v48 = vpop.f32.mrf.mxu0 }
 0x116   :  { %v171_v49 = vadd.f32 %v395_v47, %v170_v48 }
 0x117   :  { %v483_v50 = vpop.f32.mrf.mxu0 }
 0x118   :  { %v174_v51 = vmax.f32 %v171_v49, 0.0 }
 0x11a   :  { %517 = vmatmul.mubr.f32.vlgmr.msra.gmra.mxu1 %v174_v51 }
 0x1da   :  { %v264_v56 = vpop.f32.mrf.mxu1 }
 0x1db   :  { %v265_v57 = vadd.f32 %v396_v55, %v264_v56 }
 0x1dc   :  { %v518_v58 = vpop.f32.mrf.mxu1 }
 0x1dd   :  { %v268_v59 = vmax.f32 %v265_v57, 0.0 }
 0x1df   :  { %552 = vmatmul.mubr.f32.vlgmr.msra.gmra.mxu0 %v268_v59 }
 0x29f   :  { %v358_v63 = vpop.f32.mrf.mxu0 }
 0x2a0   :  { %v359_v0 = vadd.f32 %v397_v62, %v358_v63 }
 0x2a1   :  { %v553_v1 = vpop.f32.mrf.mxu0 }
 0x2a2   :  { %v365_v2 = vsel %vm364_vm1, %v359_v0, -1e+30 }
 0x2a3   :  { %366 = vmax.xlane.f32.xlu0 %v365_v2 }
 0x32c   :  { %v367_v3 = vpop.xlane.xlu0 %366 }
 0x32d   :  { %v368_v4 = vsub.f32 %v365_v2, %v367_v3 }
 0x32f   :  { %v369_v5 = vmul.f32 1.442695, %v368_v4 }
 0x331   :  { %563 = vpow2.f32 %v369_v5 }
 0x33e   :  { %v564_v6 = vpop.eup %563 }
 0x33f   :  { %371 = vadd.xlane.f32.xlu0 %v564_v6 }
 0x3c8   :  { %v372_v7 = vpop.xlane.xlu0 %371 }
 0x3c9   :  { %565 = vlog2.f32 %v372_v7 }
 0x3d6   :  { %v566_v8 = vpop.eup %565 }
 0x3d7   :  { %v374_v9 = vmul.f32 0.6931472, %v566_v8 }
 0x3d9   :  { %v375_v10 = vadd.f32 %v374_v9, %v367_v3 }
 0x3db   :  { %v376_v11 = vsub.f32 %v365_v2, %v375_v10 }
 0x3dd   :  { %377 = vst [vmem:[#allocation10] sm:$0xff] %v376_v11 }
 0x3de   :  { %658 = shalt.err (!%p655_p10)
}
 0x3df   :  { %387 = dma.vmem_to_hbm [thread:$0]  %s385_s24, 128, %s818_s7, [#allocation4]  }
 0x3e0   :  { %673 = dma.done.wait [#allocation4], 128  }
 0x3e1   :  { %674 = vsyncadd [#allocation4], 4294967168 }
 0x3e2   :  { %391 = vsyncpa [#allocation3], 1 }
 0x3e3   :  { %392 = vsyncpa [#allocation6], 1 }
 0x3e4   :  { %393 = vsyncpa [#allocation9], 1 }
 0x3e5   :  { %394 = vsyncpa [#allocation4], 1 }

// kernel: tpu_custom_call.1
= control target key start
LH: loop header
LB: loop body
LE: loop exit
PB: predicated region body
PF: predicated region fallthrough
CT: control target
= control target key end

     0   :  { %12 = vsyncpa [#allocation3], 0  ;;  %s811_s0 = inlined_call_operand.hbm [shape: f32[8,128], index: 0, kind: input, shape index: {}]   ;;  %s812_s1 = inlined_call_operand.hbm [shape: f32[128,128], index: 1, kind: input, shape index: {}]   ;;  %s813_s2 = inlined_call_operand.hbm [shape: f32[128,128], index: 2, kind: input, shape index: {}]   ;;  %s814_s3 = inlined_call_operand.hbm [shape: f32[128,128], index: 3, kind: input, shape index: {}]   ;;  %s815_s4 = inlined_call_operand.vmem [shape: f32[1,128], index: 4, kind: input, shape index: {}]   ;;  %s816_s5 = inlined_call_operand.vmem [shape: f32[1,128], index: 5, kind: input, shape index: {}]   ;;  %s817_s6 = inlined_call_operand.vmem [shape: f32[1,128], index: 6, kind: input, shape index: {}]   ;;  %s818_s7 = inlined_call_operand.hbm [shape: f32[8,128], index: 7, kind: output, shape index: {}]  }
   0x1   :  { %13 = vsyncpa [#allocation6], 0 }
   0x2   :  { %14 = vsyncpa [#allocation9], 0 }
   0x3   :  { %15 = vsyncpa [#allocation4], 0  ;;  %s675_s24 = smov [#allocation5]  }
   0x4   :  { %s31_s25 = sshll.u32 %s675_s24, 4  ;;  %s32_s25 = int_to_ptr.vmem [resolvable:$true] %s31_s25 }
   0x5   :  { %s575_s26 = scalar_lea.vmem %s32_s25, 2048  ;;  %p580_p1 = scmp.lt.s32.totalorder %s32_s25, %s32_s25 }
   0x6   :  { %p576_p0 = scmp.ne.s32.totalorder %s32_s25, %s575_s26  ;;  %p581_p2 = scmp.lt.s32.totalorder %s575_s26, %s575_s26 }
   0x8   :  { %p582_p3 = por %p581_p2, %p580_p1 }
   0xa   :  { %p583_p4 = pnand %p582_p3, %p576_p0 }
   0xc   :  { %586 = shalt.err (!%p583_p4)
}
   0xd   :  { %s676_s27 = smov 128   ;;  %s677_s28 = smov 8  }
   0xe   :  { %37 = dma.hbm_to_vmem [thread:$0]  %s812_s1, 2048, %s32_s25, [#allocation6], %s676_s27, %s676_s27, %s677_s28  }
   0xf   :  { %s678_s8 = smov [#allocation2]   ;;  %s679_s10 = smov [#allocation7]  }
  0x10   :  { %s22_s9 = sshll.u32 %s678_s8, 4  ;;  %s43_s11 = sshll.u32 %s679_s10, 4  ;;  %s23_s9 = int_to_ptr.vmem [resolvable:$true] %s22_s9  ;;  %s44_s11 = int_to_ptr.vmem [resolvable:$true] %s43_s11 }
  0x11   :  { %s595_s12 = scalar_lea.vmem %s23_s9, 128  ;;  %p600_p6 = scmp.lt.s32.totalorder %s23_s9, %s23_s9 }
  0x12   :  { %p596_p5 = scmp.ne.s32.totalorder %s23_s9, %s595_s12  ;;  %p601_p7 = scmp.lt.s32.totalorder %s595_s12, %s595_s12 }
  0x14   :  { %p602_p8 = por %p601_p7, %p600_p6 }
  0x16   :  { %p603_p9 = pnand %p602_p8, %p596_p5 }
  0x18   :  { %606 = shalt.err (!%p603_p9)
}
  0x19   :  { %25 = dma.hbm_to_vmem [thread:$0]  %s811_s0, 128, %s23_s9, [#allocation3]  }
  0x1a   :  { %s615_s15 = scalar_lea.vmem %s44_s11, 2048  ;;  %p620_p11 = scmp.lt.s32.totalorder %s44_s11, %s44_s11 }
  0x1b   :  { %p616_p10 = scmp.ne.s32.totalorder %s44_s11, %s615_s15  ;;  %p621_p12 = scmp.lt.s32.totalorder %s615_s15, %s615_s15 }
  0x1d   :  { %p622_p13 = por %p621_p12, %p620_p11 }
  0x1f   :  { %p623_p0 = pnand %p622_p13, %p616_p10 }
  0x21   :  { %626 = shalt.err (!%p623_p0)
}
  0x22   :  { %49 = dma.hbm_to_vmem [thread:$0]  %s813_s2, 2048, %s44_s11, [#allocation6], %s676_s27, %s676_s27, %s677_s28  }
  0x23   :  { %s680_s17 = smov [#allocation8]  }
  0x24   :  { %s55_s18 = sshll.u32 %s680_s17, 4  ;;  %s56_s18 = int_to_ptr.vmem [resolvable:$true] %s55_s18 }
  0x25   :  { %s635_s19 = scalar_lea.vmem %s56_s18, 2048  ;;  %p640_p2 = scmp.lt.s32.totalorder %s56_s18, %s56_s18 }
  0x26   :  { %p636_p1 = scmp.ne.s32.totalorder %s56_s18, %s635_s19  ;;  %p641_p3 = scmp.lt.s32.totalorder %s635_s19, %s635_s19 }
  0x28   :  { %p642_p4 = por %p641_p3, %p640_p2 }
  0x2a   :  { %p643_p5 = pnand %p642_p4, %p636_p1 }
  0x2c   :  { %646 = shalt.err (!%p643_p5)
}
  0x2d   :  { %61 = dma.hbm_to_vmem [thread:$0]  %s814_s3, 2048, %s56_s18, [#allocation9], %s676_s27, %s676_s27, %s677_s28  }
  0x2e   :  { %667 = dma.done.wait [#allocation3], 128  }
  0x2f   :  { %668 = vsyncadd [#allocation3], 4294967168 }
  0x30   :  { %669 = dma.done.wait [#allocation6], 4096  }
  0x31   :  { %670 = vsyncadd [#allocation6], 4294963200 }
  0x32   :  { %671 = dma.done.wait [#allocation9], 2048  }
  0x33   :  { %672 = vsyncadd [#allocation9], 4294965248  ;;  %v681_v0 = vmov 0.0   ;;  %vm682_vm0 = vmmov 0   ;;  %v96_v1 = vld [vmem:[#allocation5 + $0x78] sm:$0xff]  ;;  %v95_v2 = vld [vmem:[#allocation5 + $0x70] sm:$0xff]  ;;  %v362_v60 = vlaneseq }
  0x34   :  { %449 = vmatprep.subr.mxu0 %v681_v0  ;;  %481 = vmatprep.mubr.msk.f32.mxu0 %vm682_vm0, %v681_v0  ;;  %v94_v3 = vld [vmem:[#allocation5 + $0x68] sm:$0xff]  ;;  %v93_v4 = vld [vmem:[#allocation5 + $0x60] sm:$0xff]  ;;  %v190_v5 = vld [vmem:[#allocation7 + $0x78] sm:$0xff] }
  0x35   :  { %484 = vmatprep.subr.mxu1 %v681_v0  ;;  %516 = vmatprep.mubr.msk.f32.mxu1 %vm682_vm0, %v681_v0  ;;  %v92_v6 = vld [vmem:[#allocation5 + $0x58] sm:$0xff]  ;;  %v189_v7 = vld [vmem:[#allocation7 + $0x70] sm:$0xff]  ;;  %v188_v8 = vld [vmem:[#allocation7 + $0x68] sm:$0xff]  ;;  %v363_v61 = vand.u32 127, %v362_v60 }
  0x36   :  { %450 = vmatpush3.msra.mxu0 %v96_v1  ;;  %485 = vmatpush3.msra.mxu1 %v190_v5  ;;  %v91_v9 = vld [vmem:[#allocation5 + $0x50] sm:$0xff]  ;;  %v187_v10 = vld [vmem:[#allocation7 + $0x60] sm:$0xff]  ;;  %v90_v11 = vld [vmem:[#allocation5 + $0x48] sm:$0xff] }
  0x37   :  { %451 = vmatprep.subr.mxu0 %v681_v0  ;;  %486 = vmatprep.subr.mxu1 %v681_v0  ;;  %v186_v12 = vld [vmem:[#allocation7 + $0x58] sm:$0xff]  ;;  %v89_v13 = vld [vmem:[#allocation5 + $0x40] sm:$0xff]  ;;  %v185_v14 = vld [vmem:[#allocation7 + $0x50] sm:$0xff]  ;;  %vm364_vm1 = vcmp.lt.s32.totalorder %v363_v61, 8 }
  0x38   :  { %452 = vmatpush3.msra.mxu0 %v95_v2  ;;  %487 = vmatpush3.msra.mxu1 %v189_v7  ;;  %v88_v15 = vld [vmem:[#allocation5 + $0x38] sm:$0xff]  ;;  %v184_v16 = vld [vmem:[#allocation7 + $0x48] sm:$0xff]  ;;  %v87_v17 = vld [vmem:[#allocation5 + $0x30] sm:$0xff] }
  0x39   :  { %453 = vmatprep.subr.mxu0 %v681_v0  ;;  %488 = vmatprep.subr.mxu1 %v681_v0  ;;  %v183_v18 = vld [vmem:[#allocation7 + $0x40] sm:$0xff]  ;;  %v86_v19 = vld [vmem:[#allocation5 + $0x28] sm:$0xff]  ;;  %v182_v20 = vld [vmem:[#allocation7 + $0x38] sm:$0xff] }
  0x3a   :  { %454 = vmatpush3.msra.mxu0 %v94_v3  ;;  %489 = vmatpush3.msra.mxu1 %v188_v8  ;;  %v85_v21 = vld [vmem:[#allocation5 + $0x20] sm:$0xff]  ;;  %v181_v22 = vld [vmem:[#allocation7 + $0x30] sm:$0xff]  ;;  %v84_v23 = vld [vmem:[#allocation5 + $0x18] sm:$0xff] }
  0x3b   :  { %455 = vmatprep.subr.mxu0 %v681_v0  ;;  %490 = vmatprep.subr.mxu1 %v681_v0  ;;  %v180_v24 = vld [vmem:[#allocation7 + $0x28] sm:$0xff]  ;;  %v83_v25 = vld [vmem:[#allocation5 + $0x10] sm:$0xff]  ;;  %v179_v26 = vld [vmem:[#allocation7 + $0x20] sm:$0xff] }
  0x3c   :  { %456 = vmatpush3.msra.mxu0 %v93_v4  ;;  %491 = vmatpush3.msra.mxu1 %v187_v10  ;;  %v82_v27 = vld [vmem:[#allocation5 + $0x8] sm:$0xff]  ;;  %v178_v28 = vld [vmem:[#allocation7 + $0x18] sm:$0xff]  ;;  %v81_v29 = vld [vmem:[#allocation5] sm:$0xff] }
  0x3d   :  { %457 = vmatprep.subr.mxu0 %v681_v0  ;;  %492 = vmatprep.subr.mxu1 %v681_v0  ;;  %v80_v30 = vld [vmem:[#allocation2] sm:$0xff]  ;;  %v177_v31 = vld [vmem:[#allocation7 + $0x10] sm:$0xff]  ;;  %v176_v32 = vld [vmem:[#allocation7 + $0x8] sm:$0xff] }
  0x3e   :  { %458 = vmatpush3.msra.mxu0 %v92_v6  ;;  %493 = vmatpush3.msra.mxu1 %v186_v12  ;;  %v175_v33 = vld [vmem:[#allocation7] sm:$0xff]  ;;  %v284_v34 = vld [vmem:[#allocation8 + $0x78] sm:$0xff]  ;;  %v283_v35 = vld [vmem:[#allocation8 + $0x70] sm:$0xff] }
  0x3f   :  { %459 = vmatprep.subr.mxu0 %v681_v0  ;;  %494 = vmatprep.subr.mxu1 %v681_v0  ;;  %v282_v36 = vld [vmem:[#allocation8 + $0x68] sm:$0xff]  ;;  %v281_v37 = vld [vmem:[#allocation8 + $0x60] sm:$0xff]  ;;  %v280_v38 = vld [vmem:[#allocation8 + $0x58] sm:$0xff] }
  0x40   :  { %460 = vmatpush3.msra.mxu0 %v91_v9  ;;  %495 = vmatpush3.msra.mxu1 %v185_v14  ;;  %v279_v39 = vld [vmem:[#allocation8 + $0x50] sm:$0xff]  ;;  %v278_v40 = vld [vmem:[#allocation8 + $0x48] sm:$0xff]  ;;  %v277_v41 = vld [vmem:[#allocation8 + $0x40] sm:$0xff] }
  0x41   :  { %461 = vmatprep.subr.mxu0 %v681_v0  ;;  %496 = vmatprep.subr.mxu1 %v681_v0  ;;  %v276_v42 = vld [vmem:[#allocation8 + $0x38] sm:$0xff]  ;;  %v275_v43 = vld [vmem:[#allocation8 + $0x30] sm:$0xff]  ;;  %v274_v44 = vld [vmem:[#allocation8 + $0x28] sm:$0xff] }
  0x42   :  { %462 = vmatpush3.msra.mxu0 %v90_v11  ;;  %497 = vmatpush3.msra.mxu1 %v184_v16  ;;  %v273_v45 = vld [vmem:[#allocation8 + $0x20] sm:$0xff]  ;;  %v272_v46 = vld [vmem:[#allocation8 + $0x18] sm:$0xff]  ;;  %v271_v52 = vld [vmem:[#allocation8 + $0x10] sm:$0xff] }
  0x43   :  { %463 = vmatprep.subr.mxu0 %v681_v0  ;;  %498 = vmatprep.subr.mxu1 %v681_v0  ;;  %v395_v47 = vld [vmem:[%s815_s4] ss:$0 sm:$0xff]  ;;  %v270_v53 = vld [vmem:[#allocation8 + $0x8] sm:$0xff]  ;;  %v269_v54 = vld [vmem:[#allocation8] sm:$0xff] }
  0x44   :  { %464 = vmatpush3.msra.mxu0 %v89_v13  ;;  %499 = vmatpush3.msra.mxu1 %v183_v18  ;;  %v396_v55 = vld [vmem:[%s816_s5] ss:$0 sm:$0xff]  ;;  %s683_s5 = smov [#allocation10]  }
  0x45   :  { %465 = vmatprep.subr.mxu0 %v681_v0  ;;  %500 = vmatprep.subr.mxu1 %v681_v0  ;;  %v397_v62 = vld [vmem:[%s817_s6] ss:$0 sm:$0xff]  ;;  %s384_s24 = sshll.u32 %s683_s5, 4  ;;  %s385_s24 = int_to_ptr.vmem [resolvable:$true] %s384_s24 }
  0x46   :  { %466 = vmatpush3.msra.mxu0 %v88_v15  ;;  %501 = vmatpush3.msra.mxu1 %v182_v20  ;;  %s647_s6 = scalar_lea.vmem %s385_s24, 128  ;;  %p652_p7 = scmp.lt.s32.totalorder %s385_s24, %s385_s24 }
  0x47   :  { %467 = vmatprep.subr.mxu0 %v681_v0  ;;  %502 = vmatprep.subr.mxu1 %v681_v0  ;;  %p648_p6 = scmp.ne.s32.totalorder %s385_s24, %s647_s6  ;;  %p653_p8 = scmp.lt.s32.totalorder %s647_s6, %s647_s6 }
  0x48   :  { %468 = vmatpush3.msra.mxu0 %v87_v17  ;;  %503 = vmatpush3.msra.mxu1 %v181_v22 }
  0x49   :  { %469 = vmatprep.subr.mxu0 %v681_v0  ;;  %504 = vmatprep.subr.mxu1 %v681_v0  ;;  %p654_p9 = por %p653_p8, %p652_p7 }
  0x4a   :  { %470 = vmatpush3.msra.mxu0 %v86_v19  ;;  %505 = vmatpush3.msra.mxu1 %v180_v24 }
  0x4b   :  { %471 = vmatprep.subr.mxu0 %v681_v0  ;;  %506 = vmatprep.subr.mxu1 %v681_v0  ;;  %p655_p10 = pnand %p654_p9, %p648_p6 }
  0x4c   :  { %472 = vmatpush3.msra.mxu0 %v85_v21  ;;  %507 = vmatpush3.msra.mxu1 %v179_v26 }
  0x4d   :  { %473 = vmatprep.subr.mxu0 %v681_v0  ;;  %508 = vmatprep.subr.mxu1 %v681_v0 }
  0x4e   :  { %474 = vmatpush3.msra.mxu0 %v84_v23  ;;  %509 = vmatpush3.msra.mxu1 %v178_v28 }
  0x4f   :  { %475 = vmatprep.subr.mxu0 %v681_v0  ;;  %510 = vmatprep.subr.mxu1 %v681_v0 }
  0x50   :  { %476 = vmatpush3.msra.mxu0 %v83_v25  ;;  %511 = vmatpush3.msra.mxu1 %v177_v31 }
  0x51   :  { %477 = vmatprep.subr.mxu0 %v681_v0  ;;  %512 = vmatprep.subr.mxu1 %v681_v0 }
  0x52   :  { %478 = vmatpush3.msra.mxu0 %v82_v27  ;;  %513 = vmatpush3.msra.mxu1 %v176_v32 }
  0x53   :  { %479 = vmatprep.subr.mxu0 %v681_v0  ;;  %514 = vmatprep.subr.mxu1 %v681_v0 }
  0x54   :  { %480 = vmatpush3.msra.mxu0 %v81_v29  ;;  %515 = vmatpush3.msra.mxu1 %v175_v33 }
  0x55   :  { %482 = vmatmul.mubr.f32.vlgmr.msra.gmra.mxu0 %v80_v30  ;;  %519 = vmatprep.subr.mxu0 %v681_v0 }
  0x56   :  { %551 = vmatprep.mubr.msk.f32.mxu0 %vm682_vm0, %v681_v0  ;;  %520 = vmatpush3.msra.mxu0 %v284_v34 }
  0x57   :  { %521 = vmatprep.subr.mxu0 %v681_v0 }
  0x58   :  { %522 = vmatpush3.msra.mxu0 %v283_v35 }
  0x59   :  { %523 = vmatprep.subr.mxu0 %v681_v0 }
  0x5a   :  { %524 = vmatpush3.msra.mxu0 %v282_v36 }
  0x5b   :  { %525 = vmatprep.subr.mxu0 %v681_v0 }
  0x5c   :  { %526 = vmatpush3.msra.mxu0 %v281_v37 }
  0x5d   :  { %527 = vmatprep.subr.mxu0 %v681_v0 }
  0x5e   :  { %528 = vmatpush3.msra.mxu0 %v280_v38 }
  0x5f   :  { %529 = vmatprep.subr.mxu0 %v681_v0 }
  0x60   :  { %530 = vmatpush3.msra.mxu0 %v279_v39 }
  0x61   :  { %531 = vmatprep.subr.mxu0 %v681_v0 }
  0x62   :  { %532 = vmatpush3.msra.mxu0 %v278_v40 }
  0x63   :  { %533 = vmatprep.subr.mxu0 %v681_v0 }
  0x64   :  { %534 = vmatpush3.msra.mxu0 %v277_v41 }
  0x65   :  { %535 = vmatprep.subr.mxu0 %v681_v0 }
  0x66   :  { %536 = vmatpush3.msra.mxu0 %v276_v42 }
  0x67   :  { %537 = vmatprep.subr.mxu0 %v681_v0 }
  0x68   :  { %538 = vmatpush3.msra.mxu0 %v275_v43 }
  0x69   :  { %539 = vmatprep.subr.mxu0 %v681_v0 }
  0x6a   :  { %540 = vmatpush3.msra.mxu0 %v274_v44 }
  0x6b   :  { %541 = vmatprep.subr.mxu0 %v681_v0 }
  0x6c   :  { %542 = vmatpush3.msra.mxu0 %v273_v45 }
  0x6d   :  { %543 = vmatprep.subr.mxu0 %v681_v0 }
  0x6e   :  { %544 = vmatpush3.msra.mxu0 %v272_v46 }
  0x6f   :  { %545 = vmatprep.subr.mxu0 %v681_v0 }
  0x70   :  { %546 = vmatpush3.msra.mxu0 %v271_v52 }
  0x71   :  { %547 = vmatprep.subr.mxu0 %v681_v0 }
  0x72   :  { %548 = vmatpush3.msra.mxu0 %v270_v53 }
  0x73   :  { %549 = vmatprep.subr.mxu0 %v681_v0 }
  0x74   :  { %550 = vmatpush3.msra.mxu0 %v269_v54 }
 0x115   :  { %v170_v48 = vpop.f32.mrf.mxu0 }
 0x116   :  { %v171_v49 = vadd.f32 %v395_v47, %v170_v48 }
 0x117   :  { %v483_v50 = vpop.f32.mrf.mxu0 }
 0x118   :  { %v174_v51 = vmax.f32 %v171_v49, 0.0 }
 0x11a   :  { %517 = vmatmul.mubr.f32.vlgmr.msra.gmra.mxu1 %v174_v51 }
 0x1da   :  { %v264_v56 = vpop.f32.mrf.mxu1 }
 0x1db   :  { %v265_v57 = vadd.f32 %v396_v55, %v264_v56 }
 0x1dc   :  { %v518_v58 = vpop.f32.mrf.mxu1 }
 0x1dd   :  { %v268_v59 = vmax.f32 %v265_v57, 0.0 }
 0x1df   :  { %552 = vmatmul.mubr.f32.vlgmr.msra.gmra.mxu0 %v268_v59 }
 0x29f   :  { %v358_v63 = vpop.f32.mrf.mxu0 }
 0x2a0   :  { %v359_v0 = vadd.f32 %v397_v62, %v358_v63 }
 0x2a1   :  { %v553_v1 = vpop.f32.mrf.mxu0 }
 0x2a2   :  { %v365_v2 = vsel %vm364_vm1, %v359_v0, -1e+30 }
 0x2a3   :  { %366 = vmax.xlane.f32.xlu0 %v365_v2 }
 0x32c   :  { %v367_v3 = vpop.xlane.xlu0 %366 }
 0x32d   :  { %v368_v4 = vsub.f32 %v365_v2, %v367_v3 }
 0x32f   :  { %v369_v5 = vmul.f32 1.442695, %v368_v4 }
 0x331   :  { %563 = vpow2.f32 %v369_v5 }
 0x33e   :  { %v564_v6 = vpop.eup %563 }
 0x33f   :  { %371 = vadd.xlane.f32.xlu0 %v564_v6 }
 0x3c8   :  { %v372_v7 = vpop.xlane.xlu0 %371 }
 0x3c9   :  { %565 = vlog2.f32 %v372_v7 }
 0x3d6   :  { %v566_v8 = vpop.eup %565 }
 0x3d7   :  { %v374_v9 = vmul.f32 0.6931472, %v566_v8 }
 0x3d9   :  { %v375_v10 = vadd.f32 %v374_v9, %v367_v3 }
 0x3db   :  { %v376_v11 = vsub.f32 %v365_v2, %v375_v10 }
 0x3dd   :  { %377 = vst [vmem:[#allocation10] sm:$0xff] %v376_v11 }
 0x3de   :  { %658 = shalt.err (!%p655_p10)
}
 0x3df   :  { %387 = dma.vmem_to_hbm [thread:$0]  %s385_s24, 128, %s818_s7, [#allocation4]  }
 0x3e0   :  { %673 = dma.done.wait [#allocation4], 128  }
 0x3e1   :  { %674 = vsyncadd [#allocation4], 4294967168 }
 0x3e2   :  { %391 = vsyncpa [#allocation3], 1 }
 0x3e3   :  { %392 = vsyncpa [#allocation6], 1 }
 0x3e4   :  { %393 = vsyncpa [#allocation9], 1 }
 0x3e5   :  { %394 = vsyncpa [#allocation4], 1 }

</bundles_post_ra>
